<compile_context>
chip_gen: v5e
topology: v5e:2x2
jax: 0.10.0
libtpu: 0.0.40
codegen_flags: <defaults>
</compile_context>

<pallas_src>
import jax
import jax.numpy as jnp
from jax.experimental import pallas as pl
from jax.experimental.pallas import tpu as pltpu

_NEG_INF = -1e30   # finite "-inf" bias for padded score columns


def _round_up(x, m):
    return (x + m - 1) // m * m


def _pick_batch_tile(B, Ls, H, itemsize, max_tb=256, enc_buf_budget=8 << 20):
    """Largest batch tile (multiple of 8, <=256) whose enc block fits the budget."""
    tb = max_tb
    while tb > 8 and tb * Ls * H * itemsize > enc_buf_budget:
        tb //= 2
    return max(8, min(tb, _round_up(B, 8)))


def general_attention_kernel(x_ref, enc_ref, wf_ref, woc_ref, out_ref, attw_ref):
    lp = attw_ref.shape[1]     # 128-padded length (score / attw lane dim)
    ls = enc_ref.shape[1]      # 8-padded length actually streamed for enc

    # (1) One fused GEMM: [emb | hidden | 1 | 0pad] @ [Wa_fold | Wo_emb_fold]
    #     -> scores (TB, Lp) and the embedded-input part of the output Linear.
    y = jnp.dot(x_ref[...], wf_ref[...], preferred_element_type=jnp.float32)
    scores = y[:, :lp]         # padded length columns carry a -1e30 folded bias
    out_emb = y[:, lp:]        # emb @ Wo_e.T + b_o (hidden rows of Wo are zero)

    # (2) Numerically stable softmax over the (padded) length axis.
    m = jnp.max(scores, axis=1, keepdims=True)
    e = jnp.exp(scores - m)
    denom = jnp.sum(e, axis=1, keepdims=True)
    w = e / denom              # exact divide: these weights are a kernel output
    attw_ref[...] = w.astype(attw_ref.dtype)              # lane-dense store

    # (3) context[b] = sum_l w[b, l] * enc[b, l, :]  -- per-row weighted reduce
    #     on the VPU/XLU (no block-diagonal GEMM / redundant MXU FLOPs).
    #     Columns >= true L have exactly-zero weight, so the 8-padded enc rows
    #     contribute nothing.
    w_ctx = w[:, :ls]
    context = jnp.sum(w_ctx[:, :, None] * enc_ref[...].astype(jnp.float32),
                      axis=1)                              # (TB, H)

    # (4) out = out_emb + context @ Wo_c.T  (bias already folded into out_emb).
    out = out_emb + jnp.dot(context.astype(woc_ref.dtype), woc_ref[...],
                            preferred_element_type=jnp.float32)
    out_ref[...] = out.astype(out_ref.dtype)               # lane-dense store


def prepare_general_attention_weights(attn_w, attn_b, out_w, out_b):
    """One-time folding/padding of the two nn.Linear parameter sets.

    Returns:
      w_fused: (Fp, Lp + Hp) — [score weight+bias(-inf pad) | emb-part of output
               weight + bias, hidden rows zeroed], K padded to a multiple of 128.
      woc:     (H, Hp)       — context part of the output weight, N padded to 128.
    """
    L, F0 = attn_w.shape                # F0 = E + H
    H = out_w.shape[0]
    E = F0 - H
    dtype = attn_w.dtype

    Lp = _round_up(L, 128)
    Hp = _round_up(H, 128)
    Fp = _round_up(F0 + 1, 128)         # + bias ("ones") row

    # Score block: y = x @ Wa.T + b_a ; padded columns get a -1e30 bias.
    w_score = jnp.zeros((Fp, Lp), dtype).at[:F0, :L].set(attn_w.T)
    bias_row = jnp.full((Lp,), _NEG_INF, dtype).at[:L].set(attn_b)
    w_score = w_score.at[F0, :].set(bias_row)

    # Output block split at the concat boundary:
    #   cat(emb, ctx) @ Wo.T + b_o == emb @ Wo[:, :E].T + ctx @ Wo[:, E:].T + b_o
    wo_t = out_w.T                                         # (E+H, H)
    w_out = jnp.zeros((Fp, Hp), dtype).at[:E, :H].set(wo_t[:E])
    w_out = w_out.at[F0, :H].set(out_b)                    # hidden rows stay zero

    w_fused = jnp.concatenate([w_score, w_out], axis=1)    # (Fp, Lp + Hp)
    woc = jnp.zeros((H, Hp), dtype).at[:, :H].set(wo_t[E:])
    return w_fused, woc


@jax.jit
def general_attention_fwd(embedded, hidden, encoder_outputs, w_fused, woc):
    B, _, E = embedded.shape
    H = hidden.shape[1]
    L = encoder_outputs.shape[1]
    dtype = embedded.dtype
    itemsize = jnp.dtype(dtype).itemsize

    Fp = w_fused.shape[0]
    Hp = woc.shape[1]
    Lp = w_fused.shape[1] - Hp
    Ls = _round_up(L, 8)                # sublane-only padding for the enc stream

    TB = _pick_batch_tile(B, Ls, H, itemsize)
    Bp = _round_up(B, TB)

    # Activations with the bias "ones" column folded in; zero-pad batch & F.
    emb2d = embedded.reshape(B, E)
    ones = jnp.ones((B, 1), dtype)
    x_aug = jnp.concatenate([emb2d, hidden, ones], axis=1)           # (B, E+H+1)
    x_aug = jnp.pad(x_aug, ((0, Bp - B), (0, Fp - (E + H + 1))))

    enc = encoder_outputs
    if (Bp, Ls) != (B, L):              # pad only when actually needed
        enc = jnp.pad(enc, ((0, Bp - B), (0, Ls - L), (0, 0)))

    # Explicit VMEM budget (double-buffered blocks + resident weights), capped
    # so the same sizing is safe on v7x (64 MiB physical VMEM).
    enc_block = TB * Ls * H * itemsize
    blk_bytes = (enc_block + TB * Fp * itemsize + TB * Hp * itemsize
                 + TB * Lp * itemsize
                 + (w_fused.size + woc.size) * itemsize)
    vmem_limit = int(min(max(2 * blk_bytes + enc_block + (4 << 20), 32 << 20),
                         48 << 20))

    grid = (Bp // TB,)

    out_pad, attw_pad = pl.pallas_call(
        general_attention_kernel,
        grid=grid,
        in_specs=[
            pl.BlockSpec((TB, Fp), lambda i: (i, 0)),
            pl.BlockSpec((TB, Ls, H), lambda i: (i, 0, 0)),
            pl.BlockSpec((Fp, Lp + Hp), lambda i: (0, 0)),   # weights resident
            pl.BlockSpec((H, Hp), lambda i: (0, 0)),
        ],
        out_specs=[
            pl.BlockSpec((TB, Hp), lambda i: (i, 0)),
            pl.BlockSpec((TB, Lp), lambda i: (i, 0)),
        ],
        out_shape=[
            jax.ShapeDtypeStruct((Bp, Hp), dtype),
            jax.ShapeDtypeStruct((Bp, Lp), dtype),
        ],
        compiler_params=pltpu.CompilerParams(
            dimension_semantics=("parallel",),
            vmem_limit_bytes=vmem_limit),
    )(x_aug, enc, w_fused, woc)

    # Strip padding; match PyTorch output shapes: (B, 1, H) and (B, 1, L).
    out = out_pad[:B, :H].reshape(B, 1, H)
    attw = attw_pad[:B, :L].reshape(B, 1, L)
    return out, attw


def _reference(embedded, hidden, encoder_outputs, attn_w, attn_b, out_w, out_b):
    emb = embedded[:, 0, :]
    x = jnp.concatenate([emb, hidden], axis=1)
    scores = x @ attn_w.T + attn_b
    w = jax.nn.softmax(scores, axis=1)
    context = jnp.einsum('bl,blh->bh', w, encoder_outputs)
    out = jnp.concatenate([emb, context], axis=1) @ out_w.T + out_b
    return out[:, None, :], w[:, None, :]


if __name__ == "__main__":
    B, E, H, L = 2, 32, 32, 8   # batch, emb_size, hidden_size, max_length

    key = jax.random.PRNGKey(0)
    k_emb, k_hid, k_enc, k_wa, k_ba, k_wo, k_bo = jax.random.split(key, 7)

    embedded = jax.random.normal(k_emb, (B, 1, E), dtype=jnp.float32)
    hidden = jax.random.normal(k_hid, (B, H), dtype=jnp.float32)
    encoder_outputs = jax.random.normal(k_enc, (B, L, H), dtype=jnp.float32)

    # nn.Linear(E+H, L) / nn.Linear(E+H, H) shaped parameters.
    bound = 1.0 / jnp.sqrt(jnp.float32(E + H))
    attn_w = jax.random.uniform(k_wa, (L, E + H), jnp.float32, -bound, bound)
    attn_b = jax.random.uniform(k_ba, (L,), jnp.float32, -bound, bound)
    out_w = jax.random.uniform(k_wo, (H, E + H), jnp.float32, -bound, bound)
    out_b = jax.random.uniform(k_bo, (H,), jnp.float32, -bound, bound)

    # One-time weight folding/padding (hoisted out of the per-step path).
    w_fused, woc = prepare_general_attention_weights(attn_w, attn_b, out_w, out_b)
    w_fused, woc = jax.block_until_ready((w_fused, woc))

    out, attw = general_attention_fwd(embedded, hidden, encoder_outputs,
                                      w_fused, woc)
    jax.block_until_ready((out, attw))

    out_ref, attw_ref = _reference(embedded, hidden, encoder_outputs,
                                   attn_w, attn_b, out_w, out_b)
    assert out.shape == (B, 1, H) and attw.shape == (B, 1, L)
    assert jnp.allclose(out, out_ref, atol=1e-4, rtol=1e-4)
    assert jnp.allclose(attw, attw_ref, atol=1e-5, rtol=1e-4)

    print("KERNEL_OK")
</pallas_src>

<mosaic_0001>
module attributes {stable_mosaic.version = 11 : i64} {
  func.func @general_attention_kernel(%arg0: i32, %arg1: memref<8x128xf32, #tpu.memory_space<vmem>>, %arg2: memref<8x8x32xf32, #tpu.memory_space<vmem>>, %arg3: memref<128x256xf32, #tpu.memory_space<vmem>>, %arg4: memref<32x128xf32, #tpu.memory_space<vmem>>, %arg5: memref<8x128xf32, #tpu.memory_space<vmem>>, %arg6: memref<8x128xf32, #tpu.memory_space<vmem>>) attributes {dimension_semantics = [#tpu.dimension_semantics<parallel>], iteration_bounds = array<i64: 1>, scalar_prefetch = 0 : i64, scratch_operands = 0 : i64, tpu.core_type = #tpu.core_type<tc>, window_params = [{transform_indices = @transform_0, window_bounds = array<i64: 8, 128>}, {transform_indices = @transform_1, window_bounds = array<i64: 8, 8, 32>}, {pipeline_mode = #tpu.pipeline_mode<synchronous>, transform_indices = @transform_2, window_bounds = array<i64: 128, 256>}, {pipeline_mode = #tpu.pipeline_mode<synchronous>, transform_indices = @transform_3, window_bounds = array<i64: 32, 128>}, {transform_indices = @transform_4, window_bounds = array<i64: 8, 128>}, {transform_indices = @transform_5, window_bounds = array<i64: 8, 128>}]} {
    %c0 = arith.constant 0 : index
    %c0_0 = arith.constant 0 : index
    %0 = vector.load %arg1[%c0, %c0_0] : memref<8x128xf32, #tpu.memory_space<vmem>>, vector<8x128xf32>
    %c0_1 = arith.constant 0 : index
    %c0_2 = arith.constant 0 : index
    %1 = vector.load %arg3[%c0_1, %c0_2] : memref<128x256xf32, #tpu.memory_space<vmem>>, vector<128x256xf32>
    %cst = arith.constant dense<0.000000e+00> : vector<8x256xf32>
    %2 = tpu.matmul %0, %1, %cst {dimension_numbers = #tpu.dot_dimension_numbers<[1], [0], [0], [1], [0, 0, 1, 1], [], []>} : vector<8x128xf32>, vector<128x256xf32>, vector<8x256xf32> -> vector<8x256xf32>
    %3 = vector.extract_strided_slice %2 {offsets = [0, 0], sizes = [8, 128], strides = [1, 1]} : vector<8x256xf32> to vector<8x128xf32>
    %4 = vector.extract_strided_slice %2 {offsets = [0, 128], sizes = [8, 128], strides = [1, 1]} : vector<8x256xf32> to vector<8x128xf32>
    %cst_3 = arith.constant dense<0xFF800000> : vector<8xf32>
    %5 = vector.multi_reduction <maximumf>, %3, %cst_3 [1] : vector<8x128xf32> to vector<8xf32>
    %6 = vector.shape_cast %5 : vector<8xf32> to vector<8x1xf32>
    %7 = vector.broadcast %6 : vector<8x1xf32> to vector<8x128xf32>
    %8 = arith.subf %3, %7 : vector<8x128xf32>
    %9 = math.exp %8 : vector<8x128xf32>
    %cst_4 = arith.constant dense<0.000000e+00> : vector<8xf32>
    %10 = vector.multi_reduction <add>, %9, %cst_4 [1] : vector<8x128xf32> to vector<8xf32>
    %11 = vector.shape_cast %10 : vector<8xf32> to vector<8x1xf32>
    %12 = vector.broadcast %11 : vector<8x1xf32> to vector<8x128xf32>
    %13 = arith.divf %9, %12 : vector<8x128xf32>
    %c0_5 = arith.constant 0 : index
    %c0_6 = arith.constant 0 : index
    %14 = vector.load %arg6[%c0_5, %c0_6] : memref<8x128xf32, #tpu.memory_space<vmem>>, vector<8x128xf32>
    tpu.vector_store %arg6[%c0_5, %c0_6], %13 {strides = array<i32>} : memref<8x128xf32, #tpu.memory_space<vmem>>, vector<8x128xf32>,
    %15 = vector.extract_strided_slice %13 {offsets = [0, 0], sizes = [8, 8], strides = [1, 1]} : vector<8x128xf32> to vector<8x8xf32>
    %16 = vector.shape_cast %15 : vector<8x8xf32> to vector<8x8x1xf32>
    %c0_7 = arith.constant 0 : index
    %c0_8 = arith.constant 0 : index
    %c0_9 = arith.constant 0 : index
    %17 = vector.load %arg2[%c0_7, %c0_8, %c0_9] : memref<8x8x32xf32, #tpu.memory_space<vmem>>, vector<8x8x32xf32>
    %18 = vector.broadcast %16 : vector<8x8x1xf32> to vector<8x8x32xf32>
    %19 = arith.mulf %18, %17 : vector<8x8x32xf32>
    %cst_10 = arith.constant dense<0.000000e+00> : vector<8x32xf32>
    %20 = vector.multi_reduction <add>, %19, %cst_10 [1] : vector<8x8x32xf32> to vector<8x32xf32>
    %c0_11 = arith.constant 0 : index
    %c0_12 = arith.constant 0 : index
    %21 = vector.load %arg4[%c0_11, %c0_12] : memref<32x128xf32, #tpu.memory_space<vmem>>, vector<32x128xf32>
    %cst_13 = arith.constant dense<0.000000e+00> : vector<8x128xf32>
    %22 = tpu.matmul %20, %21, %cst_13 {dimension_numbers = #tpu.dot_dimension_numbers<[1], [0], [0], [1], [0, 0, 1, 1], [], []>} : vector<8x32xf32>, vector<32x128xf32>, vector<8x128xf32> -> vector<8x128xf32>
    %23 = arith.addf %4, %22 : vector<8x128xf32>
    %c0_14 = arith.constant 0 : index
    %c0_15 = arith.constant 0 : index
    %24 = vector.load %arg5[%c0_14, %c0_15] : memref<8x128xf32, #tpu.memory_space<vmem>>, vector<8x128xf32>
    tpu.vector_store %arg5[%c0_14, %c0_15], %23 {strides = array<i32>} : memref<8x128xf32, #tpu.memory_space<vmem>>, vector<8x128xf32>,
    return
  }
  func.func @transform_0(%arg0: i32) -> (i32, i32) {
    %c0_i32 = arith.constant 0 : i32
    %c0_i32_0 = arith.constant 0 : i32
    return %arg0, %c0_i32 : i32, i32
  }
  func.func @transform_1(%arg0: i32) -> (i32, i32, i32) {
    %c0_i32 = arith.constant 0 : i32
    %c0_i32_0 = arith.constant 0 : i32
    %c0_i32_1 = arith.constant 0 : i32
    return %arg0, %c0_i32, %c0_i32_0 : i32, i32, i32
  }
  func.func @transform_2(%arg0: i32) -> (i32, i32) {
    %c0_i32 = arith.constant 0 : i32
    %c0_i32_0 = arith.constant 0 : i32
    %c0_i32_1 = arith.constant 0 : i32
    return %c0_i32, %c0_i32_0 : i32, i32
  }
  func.func @transform_3(%arg0: i32) -> (i32, i32) {
    %c0_i32 = arith.constant 0 : i32
    %c0_i32_0 = arith.constant 0 : i32
    %c0_i32_1 = arith.constant 0 : i32
    return %c0_i32, %c0_i32_0 : i32, i32
  }
  func.func @transform_4(%arg0: i32) -> (i32, i32) {
    %c0_i32 = arith.constant 0 : i32
    %c0_i32_0 = arith.constant 0 : i32
    return %arg0, %c0_i32 : i32, i32
  }
  func.func @transform_5(%arg0: i32) -> (i32, i32) {
    %c0_i32 = arith.constant 0 : i32
    %c0_i32_0 = arith.constant 0 : i32
    return %arg0, %c0_i32 : i32, i32
  }
}

</mosaic_0001>

<bundles_post_ra>
// kernel: general_attention_fwd.1
= control target key start
LH: loop header
LB: loop body
LE: loop exit
PB: predicated region body
PF: predicated region fallthrough
CT: control target
= control target key end

     0   :  { %11 = vsyncpa [#allocation3], 0  ;;  %s356_s21 = smov [#allocation2]   ;;  %s357_s23 = smov 256   ;;  %s450_s0 = inlined_call_operand.vmem [shape: f32[8,128], index: 0, kind: input, shape index: {}]   ;;  %s451_s1 = inlined_call_operand.vmem [shape: f32[8,8,32], index: 1, kind: input, shape index: {}]   ;;  %s452_s2 = inlined_call_operand.hbm [shape: f32[128,256], index: 2, kind: input, shape index: {}]   ;;  %s453_s3 = inlined_call_operand.vmem [shape: f32[32,128], index: 3, kind: input, shape index: {}]   ;;  %s454_s4 = inlined_call_operand.vmem [shape: f32[8,128], index: 4, kind: output, shape index: {0}]   ;;  %s455_s5 = inlined_call_operand.vmem [shape: f32[8,128], index: 5, kind: output, shape index: {1}]  }
   0x1   :  { %s20_s20 = sshll.u32 %s452_s2, 4  ;;  %s22_s22 = sshll.u32 %s356_s21, 4  ;;  %s21_s20 = int_to_ptr.hbm [resolvable:$true] %s20_s20  ;;  %s23_s22 = int_to_ptr.vmem [resolvable:$true] %s22_s22 }
   0x2   :  { %s358_s24 = smov 16  }
   0x3   :  { %28 = dma.hbm_to_vmem [thread:$0]  %s21_s20, 4096, %s23_s22, [#allocation3], %s357_s23, %s357_s23, %s358_s24  }
   0x4   :  { %354 = dma.done.wait [#allocation3], 4096  }
   0x5   :  { %355 = vsyncadd [#allocation3], 4294963200  ;;  %v66_v0 = vld [vmem:[#allocation2 + $0xf0] sm:$0xff]  ;;  %v64_v1 = vld [vmem:[#allocation2 + $0xe0] sm:$0xff]  ;;  %v132_v22 = vlaneseq  ;;  %vm203_vm4 = vcmask 261120   ;;  %vm272_vm5 = vcmask 1041409  }
   0x6   :  { %68 = vmatpush.msra.mxu0 %v66_v0  ;;  %v62_v2 = vld [vmem:[#allocation2 + $0xd0] sm:$0xff]  ;;  %v60_v3 = vld [vmem:[#allocation2 + $0xc0] sm:$0xff]  ;;  %v67_v44 = vld [vmem:[#allocation2 + $0xf8] sm:$0xff]  ;;  %vm274_vm6 = vcmask 1042434   ;;  %vm276_vm7 = vcmask 1043459   ;;  %vm278_vm8 = vcmask 1044484  }
   0x7   :  { %v58_v4 = vld [vmem:[#allocation2 + $0xb0] sm:$0xff]  ;;  %v56_v5 = vld [vmem:[#allocation2 + $0xa0] sm:$0xff]  ;;  %v133_v23 = vshrl.u32 %v132_v22, 7  ;;  %88 = vmatpush.msra.mxu1 %v67_v44  ;;  %v65_v45 = vld [vmem:[#allocation2 + $0xe8] sm:$0xff]  ;;  %vm280_vm9 = vcmask 1045509   ;;  %vm282_vm10 = vcmask 1046534  }
   0x8   :  { %69 = vmatpush.msra.mxu0 %v64_v1  ;;  %v54_v6 = vld [vmem:[#allocation2 + $0x90] sm:$0xff]  ;;  %v52_v7 = vld [vmem:[#allocation2 + $0x80] sm:$0xff]  ;;  %v63_v47 = vld [vmem:[#allocation2 + $0xd8] sm:$0xff]  ;;  %vm284_vm11 = vcmask 1047559  }
   0x9   :  { %v50_v8 = vld [vmem:[#allocation2 + $0x70] sm:$0xff]  ;;  %v48_v9 = vld [vmem:[#allocation2 + $0x60] sm:$0xff]  ;;  %325 = vset.pattern.permute.xlu0 %v133_v23  ;;  %324 = vset.pattern.permute.xlu2 %v133_v23  ;;  %v61_v48 = vld [vmem:[#allocation2 + $0xc8] sm:$0xff] }
   0xa   :  { %70 = vmatpush.msra.mxu0 %v62_v2  ;;  %v46_v10 = vld [vmem:[#allocation2 + $0x50] sm:$0xff]  ;;  %v44_v11 = vld [vmem:[#allocation2 + $0x40] sm:$0xff]  ;;  %323 = vset.pattern.permute.xlu1 %v133_v23  ;;  %v59_v49 = vld [vmem:[#allocation2 + $0xb8] sm:$0xff] }
   0xb   :  { %v42_v12 = vld [vmem:[#allocation2 + $0x30] sm:$0xff]  ;;  %v40_v13 = vld [vmem:[#allocation2 + $0x20] sm:$0xff]  ;;  %89 = vmatpush.msra.mxu1 %v65_v45  ;;  %v57_v50 = vld [vmem:[#allocation2 + $0xa8] sm:$0xff] }
   0xc   :  { %71 = vmatpush.msra.mxu0 %v60_v3  ;;  %v38_v14 = vld [vmem:[#allocation2 + $0x10] sm:$0xff]  ;;  %v36_v15 = vld [vmem:[#allocation2] sm:$0xff]  ;;  %v55_v51 = vld [vmem:[#allocation2 + $0x98] sm:$0xff] }
   0xd   :  { %v395_v16 = vld [vmem:[%s450_s0] sm:$0xff]  ;;  %90 = vmatpush.msra.mxu1 %v63_v47  ;;  %v189_v52 = vld [vmem:[%s451_s1 + $0x10] sm:$0xff]  ;;  %v53_v54 = vld [vmem:[#allocation2 + $0x88] sm:$0xff] }
   0xe   :  { %72 = vmatpush.msra.mxu0 %v58_v4  ;;  %v187_v55 = vld [vmem:[%s451_s1] sm:$0xff]  ;;  %v51_v56 = vld [vmem:[#allocation2 + $0x78] sm:$0xff]  ;;  %v49_v61 = vld [vmem:[#allocation2 + $0x68] sm:$0xff] }
   0xf   :  { %91 = vmatpush.msra.mxu1 %v61_v48  ;;  %v190_v58 = vld [vmem:[%s451_s1 + $0x18] sm:$0xff]  ;;  %v191_v0 = vld [vmem:[%s451_s1 + $0x20] sm:$0xff]  ;;  %v262_v4 = vld [vmem:[%s453_s3 + $0x10] sm:$0xff] }
  0x10   :  { %73 = vmatpush.msra.mxu0 %v56_v5  ;;  %v263_v62 = vld [vmem:[%s453_s3 + $0x18] sm:$0xff] }
  0x11   :  { %92 = vmatpush.msra.mxu1 %v59_v49  ;;  %300 = vmatpush.msra.mxu2 %v263_v62  ;;  %v47_v3 = vld [vmem:[#allocation2 + $0x58] sm:$0xff] }
  0x12   :  { %74 = vmatpush.msra.mxu0 %v54_v6  ;;  %v39_v22 = vld [vmem:[#allocation2 + $0x18] sm:$0xff] }
  0x13   :  { %93 = vmatpush.msra.mxu1 %v57_v50  ;;  %301 = vmatpush.msra.mxu2 %v262_v4 }
  0x14   :  { %75 = vmatpush.msra.mxu0 %v52_v7  ;;  %v45_v7 = vld [vmem:[#allocation2 + $0x48] sm:$0xff] }
  0x15   :  { %94 = vmatpush.msra.mxu1 %v55_v51 }
  0x16   :  { %76 = vmatpush.msra.mxu0 %v50_v8  ;;  %v261_v8 = vld [vmem:[%s453_s3 + $0x8] sm:$0xff] }
  0x17   :  { %95 = vmatpush.msra.mxu1 %v53_v54  ;;  %302 = vmatpush.msra.mxu2 %v261_v8 }
  0x18   :  { %77 = vmatpush.msra.mxu0 %v48_v9  ;;  %v43_v9 = vld [vmem:[#allocation2 + $0x38] sm:$0xff] }
  0x19   :  { %96 = vmatpush.msra.mxu1 %v51_v56 }
  0x1a   :  { %78 = vmatpush.msra.mxu0 %v46_v10  ;;  %v260_v10 = vld [vmem:[%s453_s3] sm:$0xff] }
  0x1b   :  { %97 = vmatpush.msra.mxu1 %v49_v61  ;;  %303 = vmatpush.msra.mxu2 %v260_v10 }
  0x1c   :  { %79 = vmatpush.msra.mxu0 %v44_v11 }
  0x1d   :  { %98 = vmatpush.msra.mxu1 %v47_v3 }
  0x1e   :  { %80 = vmatpush.msra.mxu0 %v42_v12  ;;  %v188_v12 = vld [vmem:[%s451_s1 + $0x8] sm:$0xff] }
  0x1f   :  { %99 = vmatpush.msra.mxu1 %v45_v7 }
  0x20   :  { %81 = vmatpush.msra.mxu0 %v40_v13 }
  0x21   :  { %100 = vmatpush.msra.mxu1 %v43_v9 }
  0x22   :  { %82 = vmatpush.msra.mxu0 %v38_v14 }
  0x24   :  { %83 = vmatpush.msra.mxu0 %v36_v15  ;;  %v193_v15 = vld [vmem:[%s451_s1 + $0x30] sm:$0xff] }
  0x25   :  { %84 = vmatmul.f32.vlgmr.msra.gmra.mxu0 %v395_v16 }
  0xa2   :  { %v85_v17 = vpop.f32.mrf.mxu0 }
  0xa3   :  { %108 = vmax.xlane.f32.xlu0 %v85_v17 }
 0x116   :  { %v109_v18 = vpop.xlane.xlu0 %108 }
 0x117   :  { %v110_v19 = vsub.f32 %v85_v17, %v109_v18 }
 0x119   :  { %v111_v20 = vmul.f32 1.442695, %v110_v19 }
 0x11b   :  { %326 = vpow2.f32 %v111_v20 }
 0x121   :  { %v327_v21 = vpop.eup %326 }
 0x122   :  { %113 = vadd.xlane.f32.xlu0 %v327_v21 }
 0x195   :  { %v114_v24 = vpop.xlane.xlu0 %113 }
 0x196   :  { %328 = vrcp.f32 %v114_v24  ;;  %v126_v28 = vand.u32 2147483648, %v114_v24  ;;  %v124_v30 = vand.u32 2147483647, %v114_v24  ;;  %vm120_vm1 = vweird.f32 %v114_v24 }
 0x198   :  { %v127_v32 = vor.u32 1.1754944e-38, %v126_v28  ;;  %vm125_vm3 = vcmp.eq.f32.partialorder %v124_v30, 8.507059e+37  ;;  %v37_v28 = vld [vmem:[#allocation2 + $0x8] sm:$0xff] }
 0x19c   :  { %v329_v25 = vpop.eup %328 }
 0x19d   :  { %v116_v26 = vmul.f32 %v329_v25, %v114_v24  ;;  %vm121_vm0 = vweird.f32 %v329_v25 }
 0x19e   :  { %vm122_vm2 = vmor %vm120_vm1, %vm121_vm0 }
 0x19f   :  { %v117_v27 = vsub.f32 1.0, %v116_v26 }
 0x1a1   :  { %v118_v29 = vmul.f32 %v329_v25, %v117_v27 }
 0x1a3   :  { %v119_v31 = vadd.f32 %v329_v25, %v118_v29 }
 0x1a5   :  { %v123_v33 = vsel %vm122_vm2, %v329_v25, %v119_v31 }
 0x1a6   :  { %v128_v34 = vsel %vm125_vm3, %v127_v32, %v123_v33 }
 0x1a7   :  { %v129_v35 = vmul.f32 %v327_v21, %v128_v34  ;;  %v41_v21 = vld [vmem:[#allocation2 + $0x28] sm:$0xff] }
 0x1a8   :  { %101 = vmatpush.msra.mxu1 %v41_v21 }
 0x1a9   :  { %130 = vst [vmem:[%s455_s5] sm:$0xff] %v129_v35  ;;  %v159_v36 = vperm.slane %v129_v35, 4  ;;  %v145_v37 = vperm.slane %v129_v35, 2  ;;  %v131_v38 = vperm.slane %v129_v35, 0  ;;  %v152_v39 = vperm.slane %v129_v35, 3 }
 0x1aa   :  { %v138_v40 = vperm.slane %v129_v35, 1  ;;  %v173_v41 = vperm.slane %v129_v35, 6  ;;  %v166_v42 = vperm.slane %v129_v35, 5  ;;  %v180_v43 = vperm.slane %v129_v35, 7  ;;  %102 = vmatpush.msra.mxu1 %v39_v22  ;;  %v192_v35 = vld [vmem:[%s451_s1 + $0x28] sm:$0xff] }
 0x1ab   :  { %164 = vperm.xlu0 %325, %v159_v36   ;;  %150 = vperm.xlu2 %324, %v145_v37  }
 0x1ac   :  { %136 = vperm.xlu1 %323, %v131_v38   ;;  %103 = vmatpush.msra.mxu1 %v37_v28 }
 0x1ad   :  { %104 = vmatmul.f32.vlgmr.msra.gmra.mxu1 %v395_v16  ;;  %v194_v16 = vld [vmem:[%s451_s1 + $0x38] sm:$0xff] }
 0x1b3   :  { %157 = vperm.xlu2 %324, %v152_v39  }
 0x1b4   :  { %143 = vperm.xlu1 %323, %v138_v40  }
 0x1bb   :  { %178 = vperm.xlu2 %324, %v173_v41  }
 0x1bc   :  { %171 = vperm.xlu1 %323, %v166_v42  }
 0x1c4   :  { %185 = vperm.xlu1 %323, %v180_v43  }
 0x205   :  { %v151_v46 = vpop.permute.xlu2 %150 }
 0x206   :  { %v197_v57 = vmul.f32 %v189_v52, %v151_v46 }
 0x208   :  { %v218_v5 = vsel %vm203_vm4, %v197_v57, 0.0 }
 0x209   :  { %v219_v13 = vrot.slane %v218_v5, 4 }
 0x20b   :  { %v220_v26 = vadd.f32 %v219_v13, %v218_v5 }
 0x20d   :  { %v158_v53 = vpop.permute.xlu2 %157  ;;  %v221_v36 = vrot.slane %v220_v26, 2 }
 0x20e   :  { %v198_v63 = vmul.f32 %v190_v58, %v158_v53 }
 0x20f   :  { %v222_v45 = vadd.f32 %v221_v36, %v220_v26 }
 0x210   :  { %v225_v14 = vsel %vm203_vm4, %v198_v63, 0.0 }
 0x211   :  { %v226_v23 = vrot.slane %v225_v14, 4 }
 0x213   :  { %v227_v32 = vadd.f32 %v226_v23, %v225_v14 }
 0x215   :  { %v179_v17 = vpop.permute.xlu2 %178  ;;  %v228_v43 = vrot.slane %v227_v32, 2 }
 0x216   :  { %v201_v24 = vmul.f32 %v193_v15, %v179_v17 }
 0x217   :  { %v229_v52 = vadd.f32 %v228_v43, %v227_v32 }
 0x218   :  { %v246_v33 = vsel %vm203_vm4, %v201_v24, 0.0 }
 0x219   :  { %v247_v40 = vrot.slane %v246_v33, 4  ;;  %v230_v62 = vrot.slane %v229_v52, 1 }
 0x21b   :  { %v248_v50 = vadd.f32 %v247_v40, %v246_v33  ;;  %v231_v8 = vadd.f32 %v230_v62, %v229_v52 }
 0x21d   :  { %v165_v1 = vpop.permute.xlu0 %164 }
 0x21e   :  { %v137_v59 = vpop.permute.xlu1 %136  ;;  %v199_v11 = vmul.f32 %v191_v0, %v165_v1 }
 0x21f   :  { %v195_v60 = vmul.f32 %v187_v55, %v137_v59  ;;  %v223_v55 = vrot.slane %v222_v45, 1  ;;  %v249_v59 = vrot.slane %v248_v50, 2 }
 0x220   :  { %v232_v25 = vsel %vm203_vm4, %v199_v11, 0.0 }
 0x221   :  { %v204_v2 = vsel %vm203_vm4, %v195_v60, 0.0  ;;  %v233_v31 = vrot.slane %v232_v25, 4  ;;  %v224_v1 = vadd.f32 %v223_v55, %v222_v45  ;;  %v250_v5 = vadd.f32 %v249_v59, %v248_v50 }
 0x222   :  { %v205_v6 = vrot.slane %v204_v2, 4 }
 0x223   :  { %v234_v41 = vadd.f32 %v233_v31, %v232_v25  ;;  %v251_v13 = vrot.slane %v250_v5, 1 }
 0x224   :  { %v206_v18 = vadd.f32 %v205_v6, %v204_v2 }
 0x225   :  { %v235_v51 = vrot.slane %v234_v41, 2 }
 0x226   :  { %v144_v19 = vpop.permute.xlu1 %143  ;;  %v207_v29 = vrot.slane %v206_v18, 2 }
 0x227   :  { %v196_v20 = vmul.f32 %v188_v12, %v144_v19  ;;  %v236_v60 = vadd.f32 %v235_v51, %v234_v41 }
 0x228   :  { %v208_v37 = vadd.f32 %v207_v29, %v206_v18 }
 0x229   :  { %v211_v27 = vsel %vm203_vm4, %v196_v20, 0.0  ;;  %v237_v6 = vrot.slane %v236_v60, 1  ;;  %v252_v20 = vadd.f32 %v251_v13, %v250_v5 }
 0x22a   :  { %v212_v30 = vrot.slane %v211_v27, 4  ;;  %v209_v47 = vrot.slane %v208_v37, 1  ;;  %v105_v24 = vpop.f32.mrf.mxu1 }
 0x22b   :  { %v238_v14 = vadd.f32 %v237_v6, %v236_v60 }
 0x22c   :  { %v213_v34 = vadd.f32 %v212_v30, %v211_v27  ;;  %v210_v56 = vadd.f32 %v209_v47, %v208_v37 }
 0x22e   :  { %v214_v38 = vrot.slane %v213_v34, 2  ;;  %v172_v39 = vpop.permute.xlu1 %171 }
 0x22f   :  { %v200_v42 = vmul.f32 %v192_v35, %v172_v39 }
 0x230   :  { %v215_v44 = vadd.f32 %v214_v38, %v213_v34 }
 0x231   :  { %v239_v46 = vsel %vm203_vm4, %v200_v42, 0.0 }
 0x232   :  { %v216_v48 = vrot.slane %v215_v44, 1  ;;  %v240_v49 = vrot.slane %v239_v46, 4 }
 0x234   :  { %v217_v53 = vadd.f32 %v216_v48, %v215_v44  ;;  %v241_v54 = vadd.f32 %v240_v49, %v239_v46 }
 0x236   :  { %v242_v57 = vrot.slane %v241_v54, 2  ;;  %v186_v58 = vpop.permute.xlu1 %185  ;;  %v273_v63 = vsel %vm272_vm5, %v217_v53, %v210_v56 }
 0x237   :  { %v202_v61 = vmul.f32 %v194_v16, %v186_v58  ;;  %v275_v7 = vsel %vm274_vm6, %v224_v1, %v273_v63 }
 0x238   :  { %v243_v0 = vadd.f32 %v242_v57, %v241_v54  ;;  %v277_v12 = vsel %vm276_vm7, %v231_v8, %v275_v7 }
 0x239   :  { %v253_v2 = vsel %vm203_vm4, %v202_v61, 0.0  ;;  %v279_v17 = vsel %vm278_vm8, %v238_v14, %v277_v12 }
 0x23a   :  { %v244_v3 = vrot.slane %v243_v0, 1  ;;  %v254_v4 = vrot.slane %v253_v2, 4 }
 0x23c   :  { %v255_v9 = vadd.f32 %v254_v4, %v253_v2  ;;  %v245_v10 = vadd.f32 %v244_v3, %v243_v0 }
 0x23e   :  { %v256_v11 = vrot.slane %v255_v9, 2  ;;  %v281_v19 = vsel %vm280_vm9, %v245_v10, %v279_v17 }
 0x23f   :  { %v283_v22 = vsel %vm282_vm10, %v252_v20, %v281_v19 }
 0x240   :  { %v257_v15 = vadd.f32 %v256_v11, %v255_v9 }
 0x242   :  { %v258_v18 = vrot.slane %v257_v15, 1 }
 0x244   :  { %v259_v21 = vadd.f32 %v258_v18, %v257_v15 }
 0x246   :  { %v285_v23 = vsel %vm284_vm11, %v259_v21, %v283_v22 }
 0x247   :  { %319 = vmatmul.msk.f32.vlgmr.msra.gmra.mxu2 %vm203_vm4, %v285_v23 }
 0x2ca   :  { %v305_v25 = vpop.f32.mrf.mxu2 }
 0x2cb   :  { %v308_v26 = vadd.f32 %v305_v25, %v105_v24 }
 0x2cd   :  { %309 = vst [vmem:[%s454_s4] sm:$0xff] %v308_v26 }
 0x2ce   :  { %318 = vsyncpa [#allocation3], 1 }

</bundles_post_ra>
